<compile_context>
chip_gen: v7x
topology: tpu7x:2x2x1
jax: 0.10.0
libtpu: 0.0.40
codegen_flags: <defaults>
</compile_context>

<pallas_src>
import jax
import jax.numpy as jnp
from jax import lax
from jax.experimental import pallas as pl
from jax.experimental.pallas import tpu as pltpu


def _round_up(x, m):
    return (x + m - 1) // m * m


# ---------------------------------------------------------------------------
# Pallas kernel: one (tile_m, K) x (K, Cp) tile of the im2col matmul.
# ---------------------------------------------------------------------------
def _matmul_tile_kernel(x_ref, w_ref, o_ref):
    o_ref[...] = jnp.dot(x_ref[...], w_ref[...],
                         preferred_element_type=jnp.float32).astype(o_ref.dtype)


def _matmul_pallas(x2d, w2d, *, tile_m):
    Mp, K = x2d.shape
    _, Cp = w2d.shape
    return pl.pallas_call(
        _matmul_tile_kernel,
        out_shape=jax.ShapeDtypeStruct((Mp, Cp), x2d.dtype),
        grid=(Mp // tile_m,),
        in_specs=[
            pl.BlockSpec((tile_m, K), lambda i: (i, 0)),   # streamed / double-buffered
            pl.BlockSpec((K, Cp), lambda i: (0, 0)),       # weights resident
        ],
        out_specs=pl.BlockSpec((tile_m, Cp), lambda i: (i, 0)),
        compiler_params=pltpu.CompilerParams(
            dimension_semantics=("parallel",)),
    )(x2d, w2d)


def conv3x3_nhwc(x_nhwc, weight_oihw, *, padding=1, dilation=1):
    """KxK, stride-1, groups-1, bias-free conv (NHWC in / NHWC out) via Pallas matmul."""
    N, H, W, Cin = x_nhwc.shape
    Cout, Cin_w, KH, KW = weight_oihw.shape
    assert Cin_w == Cin
    Hout = H + 2 * padding - dilation * (KH - 1)
    Wout = W + 2 * padding - dilation * (KW - 1)

    x_pad = jnp.pad(x_nhwc,
                    ((0, 0), (padding, padding), (padding, padding), (0, 0)))
    # im2col once in the wrapper (avoids 9 in-kernel relayout copies).
    patches = []
    for kh in range(KH):
        for kw in range(KW):
            h0, w0 = kh * dilation, kw * dilation
            patches.append(x_pad[:, h0:h0 + Hout, w0:w0 + Wout, :])
    K = KH * KW * Cin
    M = N * Hout * Wout
    x2d = jnp.concatenate(patches, axis=-1).reshape(M, K)
    # OIHW -> (KH, KW, Cin, Cout) -> (K, Cout), matching im2col ordering.
    w2d = jnp.transpose(weight_oihw, (2, 3, 1, 0)).reshape(K, Cout)

    # Lane-dense output slab + M-tile padding.
    tile_m = min(256, _round_up(M, 8))   # 256-row tiles (128 would suit v5e)
    Mp = _round_up(M, tile_m)
    Cp = _round_up(Cout, 128)
    x2d = jnp.pad(x2d, ((0, Mp - M), (0, 0)))
    w2d = jnp.pad(w2d, ((0, 0), (0, Cp - Cout)))

    out2d = _matmul_pallas(x2d, w2d, tile_m=tile_m)
    return out2d[:M, :Cout].reshape(N, Hout, Wout, Cout)


# ---------------------------------------------------------------------------
# Memory-trivial glue ops (plain JAX).
# TODO(synk): AvgPool2d(2,2), bilinear x2 upsample and residual adds stay in
#             XLA; they carry a tiny fraction of the bytes and no MXU work.
# ---------------------------------------------------------------------------
def avg_pool_2x2_nhwc(x):
    n, h, w, c = x.shape
    return x.reshape(n, h // 2, 2, w // 2, 2, c).mean(axis=(2, 4))


def _up2_along(x, axis):
    # F.interpolate(mode="bilinear", align_corners=False) at exact scale 2:
    #   out[2i]   = 0.75*in[i] + 0.25*in[max(i-1, 0)]
    #   out[2i+1] = 0.75*in[i] + 0.25*in[min(i+1, n-1)]
    n = x.shape[axis]
    first = lax.slice_in_dim(x, 0, 1, axis=axis)
    last = lax.slice_in_dim(x, n - 1, n, axis=axis)
    prev = jnp.concatenate([first, lax.slice_in_dim(x, 0, n - 1, axis=axis)], axis=axis)
    nxt = jnp.concatenate([lax.slice_in_dim(x, 1, n, axis=axis), last], axis=axis)
    even = 0.75 * x + 0.25 * prev
    odd = 0.75 * x + 0.25 * nxt
    stacked = jnp.stack([even, odd], axis=axis + 1)
    new_shape = list(x.shape)
    new_shape[axis] = 2 * n
    return stacked.reshape(new_shape)


def upsample_bilinear_x2_nhwc(x):
    return _up2_along(_up2_along(x, 1), 2)


# ---------------------------------------------------------------------------
# Octave forward (NHWC internally; NCHW at the boundaries, matching PyTorch).
# TODO(synk): the stride==2 pre-pool branches of the PyTorch sub-modules are
#             never taken by Octave (all sub-modules use stride=1) and are not
#             implemented.
# ---------------------------------------------------------------------------
def _first_octave(p, x):
    x_h2l = avg_pool_2x2_nhwc(x)
    x_h = conv3x3_nhwc(x, p["h2h"])
    x_l = conv3x3_nhwc(x_h2l, p["h2l"])
    return x_h, x_l


def _octave_conv(p, x_h, x_l):
    x_h2l = avg_pool_2x2_nhwc(x_h)
    x_h2h = conv3x3_nhwc(x_h, p["h2h"])
    x_l2h = conv3x3_nhwc(x_l, p["l2h"])
    x_l2l = conv3x3_nhwc(x_l, p["l2l"])
    x_h2l = conv3x3_nhwc(x_h2l, p["h2l"])
    x_l2h = upsample_bilinear_x2_nhwc(x_l2h)
    return x_l2h + x_h2h, x_h2l + x_l2l


def _last_octave(p, x_h, x_l):
    x_h2h = conv3x3_nhwc(x_h, p["h2h"])
    x_l2h = conv3x3_nhwc(x_l, p["l2h"])
    x_l2h = upsample_bilinear_x2_nhwc(x_l2h)
    return x_h2h + x_l2h


@jax.jit
def octave_forward(params, x_nchw):
    x = jnp.transpose(x_nchw, (0, 2, 3, 1))
    x_h, x_l = _first_octave(params["fir"], x)
    x_h, x_l = _octave_conv(params["mid1"], x_h, x_l)
    x_h, x_l = _octave_conv(params["mid1"], x_h, x_l)   # mid1 is applied twice
    x_h, x_l = _octave_conv(params["mid2"], x_h, x_l)
    out = _last_octave(params["lst"], x_h, x_l)
    return jnp.transpose(out, (0, 3, 1, 2))


# ---------------------------------------------------------------------------
# Pure-JAX reference (lax.conv + explicit PyTorch-style bilinear gather).
# ---------------------------------------------------------------------------
def _conv_ref(x, w):
    return lax.conv_general_dilated(
        x, w, (1, 1), [(1, 1), (1, 1)],
        dimension_numbers=("NCHW", "OIHW", "NCHW"))


def _pool_ref(x):
    n, c, h, w = x.shape
    return x.reshape(n, c, h // 2, 2, w // 2, 2).mean(axis=(3, 5))


def _bilinear_ref(x, out_h, out_w):
    n, c, h, w = x.shape

    def src(out_n, in_n):
        o = jnp.arange(out_n, dtype=jnp.float32)
        s = jnp.maximum((o + 0.5) * (in_n / out_n) - 0.5, 0.0)
        i0 = jnp.minimum(jnp.floor(s).astype(jnp.int32), in_n - 1)
        i1 = jnp.minimum(i0 + 1, in_n - 1)
        return i0, i1, s - i0.astype(jnp.float32)

    h0, h1, fh = src(out_h, h)
    w0, w1, fw = src(out_w, w)
    x00 = x[:, :, h0][:, :, :, w0]
    x01 = x[:, :, h0][:, :, :, w1]
    x10 = x[:, :, h1][:, :, :, w0]
    x11 = x[:, :, h1][:, :, :, w1]
    fh = fh[None, None, :, None]
    fw = fw[None, None, None, :]
    top = x00 * (1.0 - fw) + x01 * fw
    bot = x10 * (1.0 - fw) + x11 * fw
    return top * (1.0 - fh) + bot * fh


def _octave_forward_ref(params, x):
    def octave(p, xh, xl):
        xh2l = _pool_ref(xh)
        xh2h = _conv_ref(xh, p["h2h"])
        xl2h = _conv_ref(xl, p["l2h"])
        xl2l = _conv_ref(xl, p["l2l"])
        xh2l = _conv_ref(xh2l, p["h2l"])
        xl2h = _bilinear_ref(xl2h, xh2h.shape[2], xh2h.shape[3])
        return xl2h + xh2h, xh2l + xl2l

    xh2l = _pool_ref(x)
    xh = _conv_ref(x, params["fir"]["h2h"])
    xl = _conv_ref(xh2l, params["fir"]["h2l"])
    xh, xl = octave(params["mid1"], xh, xl)
    xh, xl = octave(params["mid1"], xh, xl)
    xh, xl = octave(params["mid2"], xh, xl)
    xh2h = _conv_ref(xh, params["lst"]["h2h"])
    xl2h = _conv_ref(xl, params["lst"]["l2h"])
    xl2h = _bilinear_ref(xl2h, xh2h.shape[2], xh2h.shape[3])
    return xh2h + xl2h


if __name__ == "__main__":
    # Octave(in_channels=4, out_channels=8), alpha=0.5, 3x3 kernels.
    in_ch, out_ch, alpha = 4, 8, 0.5
    N, H, W = 2, 16, 16
    K = 3

    key = jax.random.PRNGKey(0)
    keys = iter(jax.random.split(key, 16))

    def conv_w(k, cout, cin):
        fan_in = cin * K * K
        bound = 1.0 / (fan_in ** 0.5)
        return jax.random.uniform(k, (cout, cin, K, K), jnp.float32, -bound, bound)

    a_in = int(alpha * in_ch)       # 2
    a_out = int(alpha * out_ch)     # 4
    params = {
        "fir": {  # FirstOctaveConv(in_ch, out_ch)
            "h2l": conv_w(next(keys), a_in, in_ch),
            "h2h": conv_w(next(keys), in_ch - a_in, in_ch),
        },
        "mid1": {  # OctaveConv(in_ch, in_ch)
            "l2l": conv_w(next(keys), a_in, a_in),
            "l2h": conv_w(next(keys), in_ch - a_in, a_in),
            "h2l": conv_w(next(keys), a_in, in_ch - a_in),
            "h2h": conv_w(next(keys), in_ch - a_in, in_ch - a_in),
        },
        "mid2": {  # OctaveConv(in_ch, out_ch)
            "l2l": conv_w(next(keys), a_out, a_in),
            "l2h": conv_w(next(keys), out_ch - a_out, a_in),
            "h2l": conv_w(next(keys), a_out, in_ch - a_in),
            "h2h": conv_w(next(keys), out_ch - a_out, in_ch - a_in),
        },
        "lst": {  # LastOctaveConv(in_ch, out_ch)
            "l2h": conv_w(next(keys), out_ch, a_out),
            "h2h": conv_w(next(keys), out_ch, out_ch - a_out),
        },
    }
    x = jax.random.normal(next(keys), (N, in_ch, H, W), dtype=jnp.float32)

    out = octave_forward(params, x)
    out = jax.block_until_ready(out)

    ref = _octave_forward_ref(params, x)
    assert out.shape == (N, out_ch, H, W), out.shape
    assert jnp.allclose(out, ref, atol=1e-3, rtol=1e-3), \
        float(jnp.max(jnp.abs(out - ref)))
    print("KERNEL_OK")
</pallas_src>

<mosaic_0001>
module attributes {stable_mosaic.version = 11 : i64} {
  func.func @_matmul_tile_kernel(%arg0: i32, %arg1: memref<128x36xf32, #tpu.memory_space<vmem>>, %arg2: memref<36x128xf32, #tpu.memory_space<vmem>>, %arg3: memref<128x128xf32, #tpu.memory_space<vmem>>) attributes {dimension_semantics = [#tpu.dimension_semantics<parallel>], iteration_bounds = array<i64: 1>, scalar_prefetch = 0 : i64, scratch_operands = 0 : i64, tpu.core_type = #tpu.core_type<tc>, window_params = [{transform_indices = @transform_0, window_bounds = array<i64: 128, 36>}, {pipeline_mode = #tpu.pipeline_mode<synchronous>, transform_indices = @transform_1, window_bounds = array<i64: 36, 128>}, {transform_indices = @transform_2, window_bounds = array<i64: 128, 128>}]} {
    %c0 = arith.constant 0 : index
    %c0_0 = arith.constant 0 : index
    %0 = vector.load %arg1[%c0, %c0_0] : memref<128x36xf32, #tpu.memory_space<vmem>>, vector<128x36xf32>
    %c0_1 = arith.constant 0 : index
    %c0_2 = arith.constant 0 : index
    %1 = vector.load %arg2[%c0_1, %c0_2] : memref<36x128xf32, #tpu.memory_space<vmem>>, vector<36x128xf32>
    %cst = arith.constant dense<0.000000e+00> : vector<128x128xf32>
    %2 = tpu.matmul %0, %1, %cst {dimension_numbers = #tpu.dot_dimension_numbers<[1], [0], [0], [1], [0, 0, 1, 1], [], []>} : vector<128x36xf32>, vector<36x128xf32>, vector<128x128xf32> -> vector<128x128xf32>
    %c0_3 = arith.constant 0 : index
    %c0_4 = arith.constant 0 : index
    %3 = vector.load %arg3[%c0_3, %c0_4] : memref<128x128xf32, #tpu.memory_space<vmem>>, vector<128x128xf32>
    tpu.vector_store %arg3[%c0_3, %c0_4], %2 {strides = array<i32>} : memref<128x128xf32, #tpu.memory_space<vmem>>, vector<128x128xf32>,
    return
  }
  func.func @transform_0(%arg0: i32) -> (i32, i32) {
    %c0_i32 = arith.constant 0 : i32
    %c0_i32_0 = arith.constant 0 : i32
    return %arg0, %c0_i32 : i32, i32
  }
  func.func @transform_1(%arg0: i32) -> (i32, i32) {
    %c0_i32 = arith.constant 0 : i32
    %c0_i32_0 = arith.constant 0 : i32
    %c0_i32_1 = arith.constant 0 : i32
    return %c0_i32, %c0_i32_0 : i32, i32
  }
  func.func @transform_2(%arg0: i32) -> (i32, i32) {
    %c0_i32 = arith.constant 0 : i32
    %c0_i32_0 = arith.constant 0 : i32
    return %arg0, %c0_i32 : i32, i32
  }
}

module attributes {stable_mosaic.version = 11 : i64} {
  func.func @_matmul_tile_kernel(%arg0: i32, %arg1: memref<128x18xf32, #tpu.memory_space<vmem>>, %arg2: memref<18x128xf32, #tpu.memory_space<vmem>>, %arg3: memref<128x128xf32, #tpu.memory_space<vmem>>) attributes {dimension_semantics = [#tpu.dimension_semantics<parallel>], iteration_bounds = array<i64: 1>, scalar_prefetch = 0 : i64, scratch_operands = 0 : i64, tpu.core_type = #tpu.core_type<tc>, window_params = [{transform_indices = @transform_0, window_bounds = array<i64: 128, 18>}, {pipeline_mode = #tpu.pipeline_mode<synchronous>, transform_indices = @transform_1, window_bounds = array<i64: 18, 128>}, {transform_indices = @transform_2, window_bounds = array<i64: 128, 128>}]} {
    %c0 = arith.constant 0 : index
    %c0_0 = arith.constant 0 : index
    %0 = vector.load %arg1[%c0, %c0_0] : memref<128x18xf32, #tpu.memory_space<vmem>>, vector<128x18xf32>
    %c0_1 = arith.constant 0 : index
    %c0_2 = arith.constant 0 : index
    %1 = vector.load %arg2[%c0_1, %c0_2] : memref<18x128xf32, #tpu.memory_space<vmem>>, vector<18x128xf32>
    %cst = arith.constant dense<0.000000e+00> : vector<128x128xf32>
    %2 = tpu.matmul %0, %1, %cst {dimension_numbers = #tpu.dot_dimension_numbers<[1], [0], [0], [1], [0, 0, 1, 1], [], []>} : vector<128x18xf32>, vector<18x128xf32>, vector<128x128xf32> -> vector<128x128xf32>
    %c0_3 = arith.constant 0 : index
    %c0_4 = arith.constant 0 : index
    %3 = vector.load %arg3[%c0_3, %c0_4] : memref<128x128xf32, #tpu.memory_space<vmem>>, vector<128x128xf32>
    tpu.vector_store %arg3[%c0_3, %c0_4], %2 {strides = array<i32>} : memref<128x128xf32, #tpu.memory_space<vmem>>, vector<128x128xf32>,
    return
  }
  func.func @transform_0(%arg0: i32) -> (i32, i32) {
    %c0_i32 = arith.constant 0 : i32
    %c0_i32_0 = arith.constant 0 : i32
    return %arg0, %c0_i32 : i32, i32
  }
  func.func @transform_1(%arg0: i32) -> (i32, i32) {
    %c0_i32 = arith.constant 0 : i32
    %c0_i32_0 = arith.constant 0 : i32
    %c0_i32_1 = arith.constant 0 : i32
    return %c0_i32, %c0_i32_0 : i32, i32
  }
  func.func @transform_2(%arg0: i32) -> (i32, i32) {
    %c0_i32 = arith.constant 0 : i32
    %c0_i32_0 = arith.constant 0 : i32
    return %arg0, %c0_i32 : i32, i32
  }
}

module attributes {stable_mosaic.version = 11 : i64} {
  func.func @_matmul_tile_kernel(%arg0: i32, %arg1: memref<256x36xf32, #tpu.memory_space<vmem>>, %arg2: memref<36x128xf32, #tpu.memory_space<vmem>>, %arg3: memref<256x128xf32, #tpu.memory_space<vmem>>) attributes {dimension_semantics = [#tpu.dimension_semantics<parallel>], iteration_bounds = array<i64: 2>, scalar_prefetch = 0 : i64, scratch_operands = 0 : i64, tpu.core_type = #tpu.core_type<tc>, window_params = [{transform_indices = @transform_0, window_bounds = array<i64: 256, 36>}, {pipeline_mode = #tpu.pipeline_mode<synchronous>, transform_indices = @transform_1, window_bounds = array<i64: 36, 128>}, {transform_indices = @transform_2, window_bounds = array<i64: 256, 128>}]} {
    %c0 = arith.constant 0 : index
    %c0_0 = arith.constant 0 : index
    %0 = vector.load %arg1[%c0, %c0_0] : memref<256x36xf32, #tpu.memory_space<vmem>>, vector<256x36xf32>
    %c0_1 = arith.constant 0 : index
    %c0_2 = arith.constant 0 : index
    %1 = vector.load %arg2[%c0_1, %c0_2] : memref<36x128xf32, #tpu.memory_space<vmem>>, vector<36x128xf32>
    %cst = arith.constant dense<0.000000e+00> : vector<256x128xf32>
    %2 = tpu.matmul %0, %1, %cst {dimension_numbers = #tpu.dot_dimension_numbers<[1], [0], [0], [1], [0, 0, 1, 1], [], []>} : vector<256x36xf32>, vector<36x128xf32>, vector<256x128xf32> -> vector<256x128xf32>
    %c0_3 = arith.constant 0 : index
    %c0_4 = arith.constant 0 : index
    %3 = vector.load %arg3[%c0_3, %c0_4] : memref<256x128xf32, #tpu.memory_space<vmem>>, vector<256x128xf32>
    tpu.vector_store %arg3[%c0_3, %c0_4], %2 {strides = array<i32>} : memref<256x128xf32, #tpu.memory_space<vmem>>, vector<256x128xf32>,
    return
  }
  func.func @transform_0(%arg0: i32) -> (i32, i32) {
    %c0_i32 = arith.constant 0 : i32
    %c0_i32_0 = arith.constant 0 : i32
    return %arg0, %c0_i32 : i32, i32
  }
  func.func @transform_1(%arg0: i32) -> (i32, i32) {
    %c0_i32 = arith.constant 0 : i32
    %c0_i32_0 = arith.constant 0 : i32
    %c0_i32_1 = arith.constant 0 : i32
    return %c0_i32, %c0_i32_0 : i32, i32
  }
  func.func @transform_2(%arg0: i32) -> (i32, i32) {
    %c0_i32 = arith.constant 0 : i32
    %c0_i32_0 = arith.constant 0 : i32
    return %arg0, %c0_i32 : i32, i32
  }
}

module attributes {stable_mosaic.version = 11 : i64} {
  func.func @_matmul_tile_kernel(%arg0: i32, %arg1: memref<256x18xf32, #tpu.memory_space<vmem>>, %arg2: memref<18x128xf32, #tpu.memory_space<vmem>>, %arg3: memref<256x128xf32, #tpu.memory_space<vmem>>) attributes {dimension_semantics = [#tpu.dimension_semantics<parallel>], iteration_bounds = array<i64: 2>, scalar_prefetch = 0 : i64, scratch_operands = 0 : i64, tpu.core_type = #tpu.core_type<tc>, window_params = [{transform_indices = @transform_0, window_bounds = array<i64: 256, 18>}, {pipeline_mode = #tpu.pipeline_mode<synchronous>, transform_indices = @transform_1, window_bounds = array<i64: 18, 128>}, {transform_indices = @transform_2, window_bounds = array<i64: 256, 128>}]} {
    %c0 = arith.constant 0 : index
    %c0_0 = arith.constant 0 : index
    %0 = vector.load %arg1[%c0, %c0_0] : memref<256x18xf32, #tpu.memory_space<vmem>>, vector<256x18xf32>
    %c0_1 = arith.constant 0 : index
    %c0_2 = arith.constant 0 : index
    %1 = vector.load %arg2[%c0_1, %c0_2] : memref<18x128xf32, #tpu.memory_space<vmem>>, vector<18x128xf32>
    %cst = arith.constant dense<0.000000e+00> : vector<256x128xf32>
    %2 = tpu.matmul %0, %1, %cst {dimension_numbers = #tpu.dot_dimension_numbers<[1], [0], [0], [1], [0, 0, 1, 1], [], []>} : vector<256x18xf32>, vector<18x128xf32>, vector<256x128xf32> -> vector<256x128xf32>
    %c0_3 = arith.constant 0 : index
    %c0_4 = arith.constant 0 : index
    %3 = vector.load %arg3[%c0_3, %c0_4] : memref<256x128xf32, #tpu.memory_space<vmem>>, vector<256x128xf32>
    tpu.vector_store %arg3[%c0_3, %c0_4], %2 {strides = array<i32>} : memref<256x128xf32, #tpu.memory_space<vmem>>, vector<256x128xf32>,
    return
  }
  func.func @transform_0(%arg0: i32) -> (i32, i32) {
    %c0_i32 = arith.constant 0 : i32
    %c0_i32_0 = arith.constant 0 : i32
    return %arg0, %c0_i32 : i32, i32
  }
  func.func @transform_1(%arg0: i32) -> (i32, i32) {
    %c0_i32 = arith.constant 0 : i32
    %c0_i32_0 = arith.constant 0 : i32
    %c0_i32_1 = arith.constant 0 : i32
    return %c0_i32, %c0_i32_0 : i32, i32
  }
  func.func @transform_2(%arg0: i32) -> (i32, i32) {
    %c0_i32 = arith.constant 0 : i32
    %c0_i32_0 = arith.constant 0 : i32
    return %arg0, %c0_i32 : i32, i32
  }
}

</mosaic_0001>

<bundles_post_ra>
// kernel: octave_forward.17
= control target key start
LH: loop header
LB: loop body
LE: loop exit
PB: predicated region body
PF: predicated region fallthrough
CT: control target
= control target key end

     0   :  { %vm32_vm0 = vcmask 293888   ;;  %vm81_vm1 = vcmask 1043456   ;;  %s478_s1 = inlined_call_operand.vmem [shape: f32[36,128], index: 1, kind: input, shape index: {}]   ;;  %s479_s0 = inlined_call_operand.vmem [shape: f32[128,36], index: 0, kind: input, shape index: {}]   ;;  %s480_s2 = inlined_call_operand.vmem [shape: f32[128,128], index: 2, kind: output, shape index: {}]  }
   0x1   :  { %v27_v0 = vld [vmem:[%s478_s1] sm:$0xff]  ;;  %v28_v1 = vld [vmem:[%s478_s1 + $0x8] sm:$0xff]  ;;  %v29_v2 = vld [vmem:[%s478_s1 + $0x10] sm:$0xff] }
   0x2   :  { %v322_v3 = vpack.c.bf16 %v28_v1, %v27_v0  ;;  %v30_v4 = vld [vmem:[%s478_s1 + $0x18] sm:$0xff]  ;;  %v11_v5 = vld [vmem:[%s479_s0] sm:$0xff]  ;;  %v12_v9 = vld [vmem:[%s479_s0 + $0x8] sm:$0xff] }
   0x3   :  { %v326_v6 = vpack.c.bf16 %v30_v4, %v29_v2  ;;  %298 = vmatprep.mubr.msk.f32.mxu0 %vm32_vm0, %v11_v5  ;;  %v19_v7 = vld [vmem:[%s479_s0 + $0x40] sm:$0xff]  ;;  %v20_v10 = vld [vmem:[%s479_s0 + $0x48] sm:$0xff]  ;;  %v13_v11 = vld [vmem:[%s479_s0 + $0x10] sm:$0xff] }
   0x4   :  { %323 = vmatprep.subr.bf16.mxu0 %v322_v3  ;;  %330 = vmatprep.subr.bf16.mxu1 %v322_v3  ;;  %v31_v8 = vld [vmem:[%s478_s1 + $0x20] sm:$0xf]  ;;  %v21_v12 = vld [vmem:[%s479_s0 + $0x50] sm:$0xff]  ;;  %v14_v13 = vld [vmem:[%s479_s0 + $0x18] sm:$0xff] }
   0x5   :  { %325 = vmatpush3.bf16.msra.mxu0 %v322_v3  ;;  %333 = vmatpush3.bf16.msra.mxu1 %v322_v3  ;;  %v22_v14 = vld [vmem:[%s479_s0 + $0x58] sm:$0xff]  ;;  %v15_v15 = vld [vmem:[%s479_s0 + $0x20] sm:$0xff]  ;;  %v16_v17 = vld [vmem:[%s479_s0 + $0x28] sm:$0xff] }
   0x6   :  { %327 = vmatprep.subr.bf16.mxu0 %v326_v6  ;;  %331 = vmatprep.subr.bf16.mxu1 %v326_v6  ;;  %v23_v16 = vld [vmem:[%s479_s0 + $0x60] sm:$0xff]  ;;  %v24_v18 = vld [vmem:[%s479_s0 + $0x68] sm:$0xff]  ;;  %v17_v19 = vld [vmem:[%s479_s0 + $0x30] sm:$0xff] }
   0x7   :  { %310 = vmatprep.mubr.msk.f32.mxu1 %vm32_vm0, %v19_v7  ;;  %v25_v20 = vld [vmem:[%s479_s0 + $0x70] sm:$0xff]  ;;  %v18_v21 = vld [vmem:[%s479_s0 + $0x38] sm:$0xff] }
   0x8   :  { %v26_v22 = vld [vmem:[%s479_s0 + $0x78] sm:$0xff] }
   0x9   :  { %329 = vmatpush3.bf16.msra.mxu0 %v326_v6  ;;  %334 = vmatpush3.bf16.msra.mxu1 %v326_v6 }
   0xa   :  { %296 = vmatprep.subr.msk.mxu0 %vm81_vm1, %v31_v8  ;;  %332 = vmatprep.subr.msk.mxu1 %vm81_vm1, %v31_v8 }
   0xd   :  { %297 = vmatpush3.msk.msra.mxu0 %vm81_vm1, %v31_v8  ;;  %335 = vmatpush3.msk.msra.mxu1 %vm81_vm1, %v31_v8 }
   0xe   :  { %299 = vmatmul.mubr.msk.f32.vlgmr.msra.gmra.mrb[0].mxu0 %vm32_vm0, %v12_v9  ;;  %311 = vmatmul.mubr.msk.f32.vlgmr.msra.gmra.mrb[0].mxu1 %vm32_vm0, %v20_v10 }
   0xf   :  { %301 = vmatprep.mubr.msk.f32.mxu0 %vm32_vm0, %v13_v11  ;;  %313 = vmatprep.mubr.msk.f32.mxu1 %vm32_vm0, %v21_v12 }
  0x12   :  { %302 = vmatmul.mubr.msk.f32.gmra.mrb[2].mxu0 %vm32_vm0, %v14_v13  ;;  %314 = vmatmul.mubr.msk.f32.gmra.mrb[2].mxu1 %vm32_vm0, %v22_v14 }
  0x13   :  { %304 = vmatprep.mubr.msk.f32.mxu0 %vm32_vm0, %v15_v15  ;;  %316 = vmatprep.mubr.msk.f32.mxu1 %vm32_vm0, %v23_v16 }
  0x16   :  { %305 = vmatmul.mubr.msk.f32.gmra.mrb[4].mxu0 %vm32_vm0, %v16_v17  ;;  %317 = vmatmul.mubr.msk.f32.gmra.mrb[4].mxu1 %vm32_vm0, %v24_v18 }
  0x17   :  { %307 = vmatprep.mubr.msk.f32.mxu0 %vm32_vm0, %v17_v19  ;;  %319 = vmatprep.mubr.msk.f32.mxu1 %vm32_vm0, %v25_v20 }
  0x1a   :  { %308 = vmatmul.mubr.msk.f32.gmra.mrb[6].mxu0 %vm32_vm0, %v18_v21  ;;  %320 = vmatmul.mubr.msk.f32.gmra.mrb[6].mxu1 %vm32_vm0, %v26_v22 }
  0xe1   :  { %v300_v23 = vpop.f32.mrb[0].mxu0  ;;  %v312_v24 = vpop.f32.mrb[0].mxu1 }
  0xe2   :  { %231 = vst [vmem:[%s480_s2 + $0x8] sm:$0xff] %v300_v23  ;;  %239 = vst [vmem:[%s480_s2 + $0x48] sm:$0xff] %v312_v24  ;;  %v151_v25 = vpop.f32.mrb[1].mxu0  ;;  %v191_v26 = vpop.f32.mrb[1].mxu1 }
  0xe3   :  { %230 = vst [vmem:[%s480_s2] sm:$0xff] %v151_v25  ;;  %238 = vst [vmem:[%s480_s2 + $0x40] sm:$0xff] %v191_v26 }
  0xe5   :  { %v303_v27 = vpop.f32.mrb[2].mxu0  ;;  %v315_v28 = vpop.f32.mrb[2].mxu1 }
  0xe6   :  { %233 = vst [vmem:[%s480_s2 + $0x18] sm:$0xff] %v303_v27  ;;  %241 = vst [vmem:[%s480_s2 + $0x58] sm:$0xff] %v315_v28  ;;  %v161_v29 = vpop.f32.mrb[3].mxu0  ;;  %v201_v30 = vpop.f32.mrb[3].mxu1 }
  0xe7   :  { %232 = vst [vmem:[%s480_s2 + $0x10] sm:$0xff] %v161_v29  ;;  %240 = vst [vmem:[%s480_s2 + $0x50] sm:$0xff] %v201_v30 }
  0xe9   :  { %v306_v31 = vpop.f32.mrb[4].mxu0  ;;  %v318_v32 = vpop.f32.mrb[4].mxu1 }
  0xea   :  { %235 = vst [vmem:[%s480_s2 + $0x28] sm:$0xff] %v306_v31  ;;  %243 = vst [vmem:[%s480_s2 + $0x68] sm:$0xff] %v318_v32  ;;  %v171_v33 = vpop.f32.mrb[5].mxu0  ;;  %v211_v34 = vpop.f32.mrb[5].mxu1 }
  0xeb   :  { %234 = vst [vmem:[%s480_s2 + $0x20] sm:$0xff] %v171_v33  ;;  %242 = vst [vmem:[%s480_s2 + $0x60] sm:$0xff] %v211_v34 }
  0xed   :  { %v309_v35 = vpop.f32.mrb[6].mxu0  ;;  %v321_v36 = vpop.f32.mrb[6].mxu1 }
  0xee   :  { %237 = vst [vmem:[%s480_s2 + $0x38] sm:$0xff] %v309_v35  ;;  %245 = vst [vmem:[%s480_s2 + $0x78] sm:$0xff] %v321_v36  ;;  %v181_v37 = vpop.f32.mrb[7].mxu0  ;;  %v221_v38 = vpop.f32.mrb[7].mxu1 }
  0xef   :  { %236 = vst [vmem:[%s480_s2 + $0x30] sm:$0xff] %v181_v37  ;;  %244 = vst [vmem:[%s480_s2 + $0x70] sm:$0xff] %v221_v38 }

// kernel: octave_forward.20
= control target key start
LH: loop header
LB: loop body
LE: loop exit
PB: predicated region body
PF: predicated region fallthrough
CT: control target
= control target key end

     0   :  { %vm30_vm0 = vcmask 146432   ;;  %vm79_vm1 = vcmask 1041408   ;;  %s458_s1 = inlined_call_operand.vmem [shape: f32[18,128], index: 1, kind: input, shape index: {}]   ;;  %s459_s0 = inlined_call_operand.vmem [shape: f32[128,18], index: 0, kind: input, shape index: {}]   ;;  %s460_s2 = inlined_call_operand.vmem [shape: f32[128,128], index: 2, kind: output, shape index: {}]  }
   0x1   :  { %v27_v0 = vld [vmem:[%s458_s1] sm:$0xff]  ;;  %v28_v1 = vld [vmem:[%s458_s1 + $0x8] sm:$0xff]  ;;  %v29_v5 = vld [vmem:[%s458_s1 + $0x10] sm:$0x3] }
   0x2   :  { %v314_v2 = vpack.c.bf16 %v28_v1, %v27_v0  ;;  %v11_v3 = vld [vmem:[%s459_s0] sm:$0xff]  ;;  %v12_v6 = vld [vmem:[%s459_s0 + $0x8] sm:$0xff]  ;;  %v13_v8 = vld [vmem:[%s459_s0 + $0x10] sm:$0xff] }
   0x3   :  { %v19_v4 = vld [vmem:[%s459_s0 + $0x40] sm:$0xff]  ;;  %290 = vmatprep.mubr.msk.f32.mxu0 %vm30_vm0, %v11_v3  ;;  %v20_v7 = vld [vmem:[%s459_s0 + $0x48] sm:$0xff]  ;;  %v21_v9 = vld [vmem:[%s459_s0 + $0x50] sm:$0xff] }
   0x4   :  { %302 = vmatprep.mubr.msk.f32.mxu1 %vm30_vm0, %v19_v4  ;;  %315 = vmatprep.subr.bf16.mxu0 %v314_v2  ;;  %v14_v10 = vld [vmem:[%s459_s0 + $0x18] sm:$0xff]  ;;  %v15_v12 = vld [vmem:[%s459_s0 + $0x20] sm:$0xff]  ;;  %v16_v14 = vld [vmem:[%s459_s0 + $0x28] sm:$0xff] }
   0x5   :  { %318 = vmatprep.subr.bf16.mxu1 %v314_v2  ;;  %317 = vmatpush3.bf16.msra.mxu0 %v314_v2  ;;  %v22_v11 = vld [vmem:[%s459_s0 + $0x58] sm:$0xff]  ;;  %v23_v13 = vld [vmem:[%s459_s0 + $0x60] sm:$0xff]  ;;  %v24_v15 = vld [vmem:[%s459_s0 + $0x68] sm:$0xff] }
   0x6   :  { %320 = vmatpush3.bf16.msra.mxu1 %v314_v2  ;;  %288 = vmatprep.subr.msk.mxu0 %vm79_vm1, %v29_v5  ;;  %v17_v16 = vld [vmem:[%s459_s0 + $0x30] sm:$0xff]  ;;  %v18_v18 = vld [vmem:[%s459_s0 + $0x38] sm:$0xff] }
   0x7   :  { %319 = vmatprep.subr.msk.mxu1 %vm79_vm1, %v29_v5  ;;  %v25_v17 = vld [vmem:[%s459_s0 + $0x70] sm:$0xff]  ;;  %v26_v19 = vld [vmem:[%s459_s0 + $0x78] sm:$0xff] }
   0x9   :  { %289 = vmatpush3.msk.msra.mxu0 %vm79_vm1, %v29_v5 }
   0xa   :  { %321 = vmatpush3.msk.msra.mxu1 %vm79_vm1, %v29_v5  ;;  %291 = vmatmul.mubr.msk.f32.vlgmr.msra.gmra.mrb[0].mxu0 %vm30_vm0, %v12_v6 }
   0xb   :  { %303 = vmatmul.mubr.msk.f32.vlgmr.msra.gmra.mrb[0].mxu1 %vm30_vm0, %v20_v7  ;;  %293 = vmatprep.mubr.msk.f32.mxu0 %vm30_vm0, %v13_v8 }
   0xc   :  { %305 = vmatprep.mubr.msk.f32.mxu1 %vm30_vm0, %v21_v9 }
   0xe   :  { %294 = vmatmul.mubr.msk.f32.gmra.mrb[2].mxu0 %vm30_vm0, %v14_v10 }
   0xf   :  { %306 = vmatmul.mubr.msk.f32.gmra.mrb[2].mxu1 %vm30_vm0, %v22_v11  ;;  %296 = vmatprep.mubr.msk.f32.mxu0 %vm30_vm0, %v15_v12 }
  0x10   :  { %308 = vmatprep.mubr.msk.f32.mxu1 %vm30_vm0, %v23_v13 }
  0x12   :  { %297 = vmatmul.mubr.msk.f32.gmra.mrb[4].mxu0 %vm30_vm0, %v16_v14 }
  0x13   :  { %309 = vmatmul.mubr.msk.f32.gmra.mrb[4].mxu1 %vm30_vm0, %v24_v15  ;;  %299 = vmatprep.mubr.msk.f32.mxu0 %vm30_vm0, %v17_v16 }
  0x14   :  { %311 = vmatprep.mubr.msk.f32.mxu1 %vm30_vm0, %v25_v17 }
  0x16   :  { %300 = vmatmul.mubr.msk.f32.gmra.mrb[6].mxu0 %vm30_vm0, %v18_v18 }
  0x17   :  { %312 = vmatmul.mubr.msk.f32.gmra.mrb[6].mxu1 %vm30_vm0, %v26_v19 }
  0xdd   :  { %v292_v20 = vpop.f32.mrb[0].mxu0 }
  0xde   :  { %v304_v21 = vpop.f32.mrb[0].mxu1  ;;  %229 = vst [vmem:[%s460_s2 + $0x8] sm:$0xff] %v292_v20  ;;  %v149_v22 = vpop.f32.mrb[1].mxu0 }
  0xdf   :  { %237 = vst [vmem:[%s460_s2 + $0x48] sm:$0xff] %v304_v21  ;;  %v189_v23 = vpop.f32.mrb[1].mxu1  ;;  %228 = vst [vmem:[%s460_s2] sm:$0xff] %v149_v22 }
  0xe0   :  { %236 = vst [vmem:[%s460_s2 + $0x40] sm:$0xff] %v189_v23 }
  0xe1   :  { %v295_v24 = vpop.f32.mrb[2].mxu0 }
  0xe2   :  { %v307_v25 = vpop.f32.mrb[2].mxu1  ;;  %231 = vst [vmem:[%s460_s2 + $0x18] sm:$0xff] %v295_v24  ;;  %v159_v26 = vpop.f32.mrb[3].mxu0 }
  0xe3   :  { %239 = vst [vmem:[%s460_s2 + $0x58] sm:$0xff] %v307_v25  ;;  %v199_v27 = vpop.f32.mrb[3].mxu1  ;;  %230 = vst [vmem:[%s460_s2 + $0x10] sm:$0xff] %v159_v26 }
  0xe4   :  { %238 = vst [vmem:[%s460_s2 + $0x50] sm:$0xff] %v199_v27 }
  0xe5   :  { %v298_v28 = vpop.f32.mrb[4].mxu0 }
  0xe6   :  { %v310_v29 = vpop.f32.mrb[4].mxu1  ;;  %233 = vst [vmem:[%s460_s2 + $0x28] sm:$0xff] %v298_v28  ;;  %v169_v30 = vpop.f32.mrb[5].mxu0 }
  0xe7   :  { %241 = vst [vmem:[%s460_s2 + $0x68] sm:$0xff] %v310_v29  ;;  %v209_v31 = vpop.f32.mrb[5].mxu1  ;;  %232 = vst [vmem:[%s460_s2 + $0x20] sm:$0xff] %v169_v30 }
  0xe8   :  { %240 = vst [vmem:[%s460_s2 + $0x60] sm:$0xff] %v209_v31 }
  0xe9   :  { %v301_v32 = vpop.f32.mrb[6].mxu0 }
  0xea   :  { %v313_v33 = vpop.f32.mrb[6].mxu1  ;;  %235 = vst [vmem:[%s460_s2 + $0x38] sm:$0xff] %v301_v32  ;;  %v179_v34 = vpop.f32.mrb[7].mxu0 }
  0xeb   :  { %243 = vst [vmem:[%s460_s2 + $0x78] sm:$0xff] %v313_v33  ;;  %v219_v35 = vpop.f32.mrb[7].mxu1  ;;  %234 = vst [vmem:[%s460_s2 + $0x30] sm:$0xff] %v179_v34 }
  0xec   :  { %242 = vst [vmem:[%s460_s2 + $0x70] sm:$0xff] %v219_v35 }

// kernel: octave_forward.16
= control target key start
LH: loop header
LB: loop body
LE: loop exit
PB: predicated region body
PF: predicated region fallthrough
CT: control target
= control target key end

     0   :  { %s782_s9 = smov 0   ;;  %s925_s0 = inlined_call_operand.vmem [shape: f32[512,36], index: 0, kind: input, shape index: {}]   ;;  %s926_s1 = inlined_call_operand.vmem [shape: f32[36,128], index: 1, kind: input, shape index: {}]   ;;  %s927_s2 = inlined_call_operand.vmem [shape: f32[512,128], index: 2, kind: output, shape index: {}]  }
   0x1 LB: > { %s598_s10 = sadd.s32 4294967295, %s765_s9   ;;  %p602_p0 = scmp.ge.s32.totalorder %s765_s9, 1  ;;  %s765_s9 = sphi %s782_s9, %s12_s9  }
   0x2   : > { %p113_p1 = scmp.lt.s32.totalorder %s765_s9, 3 }
   0x4   : > { %p114_p2 = pnand %p602_p0, %p113_p1 }
   0x5   : > { %v179_v0 = vld [vmem:[%s926_s1] sm:$0xff] (!%p114_p2)  ;;  %v180_v1 = vld [vmem:[%s926_s1 + $0x8] sm:$0xff] (!%p114_p2)  ;;  %v181_v2 = vld [vmem:[%s926_s1 + $0x10] sm:$0xff] (!%p114_p2)  ;;  %s603_s17 = sshll.u32 (!%p114_p2), %s598_s10, 5  ;;  %vm281_vm0 = vcmask (!%p114_p2), 1043456   ;;  %vm184_vm1 = vcmask (!%p114_p2), 293888  }
   0x6   : > { %117 = sbr.rel (%p114_p2) target bundleno = 261 (0x105), region = 28  ;;  %v737_v3 = vpack.c.bf16 (!%p114_p2), %v180_v1, %v179_v0  ;;  %v182_v4 = vld [vmem:[%s926_s1 + $0x18] sm:$0xff] (!%p114_p2)  ;;  %p136_p3 = scmp.lt.s32.totalorder (!%p114_p2), %s603_s17, 63  ;;  %v183_v6 = vld [vmem:[%s926_s1 + $0x20] sm:$0xf] (!%p114_p2) }
   0x7   : > { %v741_v5 = vpack.c.bf16 (!%p114_p2), %v182_v4, %v181_v2 }
   0x8   : > { %738 = vmatprep.subr.bf16.mxu0 (!%p114_p2), %v737_v3  ;;  %745 = vmatprep.subr.bf16.mxu1 (!%p114_p2), %v737_v3 }
   0x9   : > { %740 = vmatpush3.bf16.msra.mxu0 (!%p114_p2), %v737_v3  ;;  %748 = vmatpush3.bf16.msra.mxu1 (!%p114_p2), %v737_v3 }
   0xa   : > { %742 = vmatprep.subr.bf16.mxu0 (!%p114_p2), %v741_v5  ;;  %746 = vmatprep.subr.bf16.mxu1 (!%p114_p2), %v741_v5 }
   0xd   : > { %s929_s17 = smov (!%p136_p3, %s603_s17), 63  ;;  %744 = vmatpush3.bf16.msra.mxu0 %v741_v5  ;;  %749 = vmatpush3.bf16.msra.mxu1 %v741_v5 }
   0xe   : > { %s604_s20 = sshll.u32 %s929_s17, 3  ;;  %687 = vmatprep.subr.msk.mxu0 %vm281_vm0, %v183_v6  ;;  %747 = vmatprep.subr.msk.mxu1 %vm281_vm0, %v183_v6 }
   0xf   : > { %s813_s25 = scalar_lea.vmem %s925_s0, %s604_s20  ;;  %s888_s28 = scalar_lea.vmem %s927_s2, %s604_s20 }
  0x10   : > { %v147_v7 = vld [vmem:[%s813_s25] sm:$0xff]  ;;  %v148_v9 = vld [vmem:[%s813_s25 + $0x8] sm:$0xff]  ;;  %v149_v11 = vld [vmem:[%s813_s25 + $0x10] sm:$0xff] }
  0x11   : > { %v163_v8 = vld [vmem:[%s813_s25 + $0x80] sm:$0xff]  ;;  %689 = vmatprep.mubr.msk.f32.mxu0 %vm184_vm1, %v147_v7  ;;  %v164_v10 = vld [vmem:[%s813_s25 + $0x88] sm:$0xff]  ;;  %v165_v12 = vld [vmem:[%s813_s25 + $0x90] sm:$0xff]  ;;  %688 = vmatpush3.msk.msra.mxu0 %vm281_vm0, %v183_v6 }
  0x12   : > { %713 = vmatprep.mubr.msk.f32.mxu1 %vm184_vm1, %v163_v8  ;;  %750 = vmatpush3.msk.msra.mxu1 %vm281_vm0, %v183_v6  ;;  %v150_v13 = vld [vmem:[%s813_s25 + $0x18] sm:$0xff]  ;;  %v151_v15 = vld [vmem:[%s813_s25 + $0x20] sm:$0xff]  ;;  %v152_v17 = vld [vmem:[%s813_s25 + $0x28] sm:$0xff] }
  0x13   : > { %690 = vmatmul.mubr.msk.f32.vlgmr.msra.gmra.mrb[0].mxu0 %vm184_vm1, %v148_v9  ;;  %714 = vmatmul.mubr.msk.f32.vlgmr.msra.gmra.mrb[0].mxu1 %vm184_vm1, %v164_v10  ;;  %v166_v14 = vld [vmem:[%s813_s25 + $0x98] sm:$0xff]  ;;  %v167_v16 = vld [vmem:[%s813_s25 + $0xa0] sm:$0xff]  ;;  %v168_v18 = vld [vmem:[%s813_s25 + $0xa8] sm:$0xff] }
  0x14   : > { %692 = vmatprep.mubr.msk.f32.mxu0 %vm184_vm1, %v149_v11  ;;  %716 = vmatprep.mubr.msk.f32.mxu1 %vm184_vm1, %v165_v12  ;;  %v153_v19 = vld [vmem:[%s813_s25 + $0x30] sm:$0xff]  ;;  %v154_v21 = vld [vmem:[%s813_s25 + $0x38] sm:$0xff]  ;;  %v155_v23 = vld [vmem:[%s813_s25 + $0x40] sm:$0xff] }
  0x15   : > { %v169_v20 = vld [vmem:[%s813_s25 + $0xb0] sm:$0xff]  ;;  %v170_v22 = vld [vmem:[%s813_s25 + $0xb8] sm:$0xff]  ;;  %v171_v24 = vld [vmem:[%s813_s25 + $0xc0] sm:$0xff] }
  0x16   : > { %v156_v25 = vld [vmem:[%s813_s25 + $0x48] sm:$0xff]  ;;  %v157_v27 = vld [vmem:[%s813_s25 + $0x50] sm:$0xff]  ;;  %v158_v29 = vld [vmem:[%s813_s25 + $0x58] sm:$0xff] }
  0x17   : > { %693 = vmatmul.mubr.msk.f32.gmra.mrb[2].mxu0 %vm184_vm1, %v150_v13  ;;  %717 = vmatmul.mubr.msk.f32.gmra.mrb[2].mxu1 %vm184_vm1, %v166_v14  ;;  %v172_v26 = vld [vmem:[%s813_s25 + $0xc8] sm:$0xff]  ;;  %v173_v28 = vld [vmem:[%s813_s25 + $0xd0] sm:$0xff]  ;;  %v174_v30 = vld [vmem:[%s813_s25 + $0xd8] sm:$0xff] }
  0x18   : > { %695 = vmatprep.mubr.msk.f32.mxu0 %vm184_vm1, %v151_v15  ;;  %719 = vmatprep.mubr.msk.f32.mxu1 %vm184_vm1, %v167_v16  ;;  %v159_v31 = vld [vmem:[%s813_s25 + $0x60] sm:$0xff]  ;;  %v160_v33 = vld [vmem:[%s813_s25 + $0x68] sm:$0xff]  ;;  %v161_v35 = vld [vmem:[%s813_s25 + $0x70] sm:$0xff] }
  0x19   : > { %v175_v32 = vld [vmem:[%s813_s25 + $0xe0] sm:$0xff]  ;;  %v176_v34 = vld [vmem:[%s813_s25 + $0xe8] sm:$0xff]  ;;  %v177_v36 = vld [vmem:[%s813_s25 + $0xf0] sm:$0xff] }
  0x1a   : > { %v162_v37 = vld [vmem:[%s813_s25 + $0x78] sm:$0xff] }
  0x1b   : > { %696 = vmatmul.mubr.msk.f32.gmra.mrb[4].mxu0 %vm184_vm1, %v152_v17  ;;  %720 = vmatmul.mubr.msk.f32.gmra.mrb[4].mxu1 %vm184_vm1, %v168_v18  ;;  %v178_v38 = vld [vmem:[%s813_s25 + $0xf8] sm:$0xff] }
  0x1c   : > { %698 = vmatprep.mubr.msk.f32.mxu0 %vm184_vm1, %v153_v19  ;;  %722 = vmatprep.mubr.msk.f32.mxu1 %vm184_vm1, %v169_v20 }
  0x1f   : > { %699 = vmatmul.mubr.msk.f32.gmra.mrb[6].mxu0 %vm184_vm1, %v154_v21  ;;  %723 = vmatmul.mubr.msk.f32.gmra.mrb[6].mxu1 %vm184_vm1, %v170_v22 }
  0x20   : > { %701 = vmatprep.mubr.msk.f32.mxu0 %vm184_vm1, %v155_v23  ;;  %725 = vmatprep.mubr.msk.f32.mxu1 %vm184_vm1, %v171_v24 }
  0x23   : > { %702 = vmatmul.mubr.msk.f32.gmra.mrb[8].mxu0 %vm184_vm1, %v156_v25  ;;  %726 = vmatmul.mubr.msk.f32.gmra.mrb[8].mxu1 %vm184_vm1, %v172_v26 }
  0x24   : > { %704 = vmatprep.mubr.msk.f32.mxu0 %vm184_vm1, %v157_v27  ;;  %728 = vmatprep.mubr.msk.f32.mxu1 %vm184_vm1, %v173_v28 }
  0x27   : > { %705 = vmatmul.mubr.msk.f32.gmra.mrb[10].mxu0 %vm184_vm1, %v158_v29  ;;  %729 = vmatmul.mubr.msk.f32.gmra.mrb[10].mxu1 %vm184_vm1, %v174_v30 }
  0x28   : > { %707 = vmatprep.mubr.msk.f32.mxu0 %vm184_vm1, %v159_v31  ;;  %731 = vmatprep.mubr.msk.f32.mxu1 %vm184_vm1, %v175_v32 }
  0x2b   : > { %708 = vmatmul.mubr.msk.f32.gmra.mrb[12].mxu0 %vm184_vm1, %v160_v33  ;;  %732 = vmatmul.mubr.msk.f32.gmra.mrb[12].mxu1 %vm184_vm1, %v176_v34 }
  0x2c   : > { %710 = vmatprep.mubr.msk.f32.mxu0 %vm184_vm1, %v161_v35  ;;  %734 = vmatprep.mubr.msk.f32.mxu1 %vm184_vm1, %v177_v36 }
  0x2f   : > { %711 = vmatmul.mubr.msk.f32.gmra.mrb[14].mxu0 %vm184_vm1, %v162_v37  ;;  %735 = vmatmul.mubr.msk.f32.gmra.mrb[14].mxu1 %vm184_vm1, %v178_v38 }
  0xe6   : > { %v691_v39 = vpop.f32.mrb[0].mxu0  ;;  %v715_v40 = vpop.f32.mrb[0].mxu1 }
  0xe7   : > { %511 = vst [vmem:[%s888_s28 + $0x8] sm:$0xff] %v691_v39  ;;  %527 = vst [vmem:[%s888_s28 + $0x88] sm:$0xff] %v715_v40  ;;  %v351_v41 = vpop.f32.mrb[1].mxu0  ;;  %v431_v42 = vpop.f32.mrb[1].mxu1 }
  0xe8   : > { %510 = vst [vmem:[%s888_s28] sm:$0xff] %v351_v41  ;;  %526 = vst [vmem:[%s888_s28 + $0x80] sm:$0xff] %v431_v42 }
  0xea   : > { %v694_v43 = vpop.f32.mrb[2].mxu0  ;;  %v718_v44 = vpop.f32.mrb[2].mxu1 }
  0xeb   : > { %513 = vst [vmem:[%s888_s28 + $0x18] sm:$0xff] %v694_v43  ;;  %529 = vst [vmem:[%s888_s28 + $0x98] sm:$0xff] %v718_v44  ;;  %v361_v45 = vpop.f32.mrb[3].mxu0  ;;  %v441_v46 = vpop.f32.mrb[3].mxu1 }
  0xec   : > { %512 = vst [vmem:[%s888_s28 + $0x10] sm:$0xff] %v361_v45  ;;  %528 = vst [vmem:[%s888_s28 + $0x90] sm:$0xff] %v441_v46 }
  0xee   : > { %v697_v47 = vpop.f32.mrb[4].mxu0  ;;  %v721_v48 = vpop.f32.mrb[4].mxu1 }
  0xef   : > { %515 = vst [vmem:[%s888_s28 + $0x28] sm:$0xff] %v697_v47  ;;  %531 = vst [vmem:[%s888_s28 + $0xa8] sm:$0xff] %v721_v48  ;;  %v371_v49 = vpop.f32.mrb[5].mxu0  ;;  %v451_v50 = vpop.f32.mrb[5].mxu1 }
  0xf0   : > { %514 = vst [vmem:[%s888_s28 + $0x20] sm:$0xff] %v371_v49  ;;  %530 = vst [vmem:[%s888_s28 + $0xa0] sm:$0xff] %v451_v50 }
  0xf2   : > { %v700_v51 = vpop.f32.mrb[6].mxu0  ;;  %v724_v52 = vpop.f32.mrb[6].mxu1 }
  0xf3   : > { %517 = vst [vmem:[%s888_s28 + $0x38] sm:$0xff] %v700_v51  ;;  %533 = vst [vmem:[%s888_s28 + $0xb8] sm:$0xff] %v724_v52  ;;  %v381_v53 = vpop.f32.mrb[7].mxu0  ;;  %v461_v54 = vpop.f32.mrb[7].mxu1 }
  0xf4   : > { %516 = vst [vmem:[%s888_s28 + $0x30] sm:$0xff] %v381_v53  ;;  %532 = vst [vmem:[%s888_s28 + $0xb0] sm:$0xff] %v461_v54 }
  0xf6   : > { %v703_v55 = vpop.f32.mrb[8].mxu0  ;;  %v727_v56 = vpop.f32.mrb[8].mxu1 }
  0xf7   : > { %519 = vst [vmem:[%s888_s28 + $0x48] sm:$0xff] %v703_v55  ;;  %535 = vst [vmem:[%s888_s28 + $0xc8] sm:$0xff] %v727_v56  ;;  %v391_v57 = vpop.f32.mrb[9].mxu0  ;;  %v471_v58 = vpop.f32.mrb[9].mxu1 }
  0xf8   : > { %518 = vst [vmem:[%s888_s28 + $0x40] sm:$0xff] %v391_v57  ;;  %534 = vst [vmem:[%s888_s28 + $0xc0] sm:$0xff] %v471_v58 }
  0xfa   : > { %v706_v59 = vpop.f32.mrb[10].mxu0  ;;  %v730_v60 = vpop.f32.mrb[10].mxu1 }
  0xfb   : > { %521 = vst [vmem:[%s888_s28 + $0x58] sm:$0xff] %v706_v59  ;;  %537 = vst [vmem:[%s888_s28 + $0xd8] sm:$0xff] %v730_v60  ;;  %v401_v61 = vpop.f32.mrb[11].mxu0  ;;  %v481_v62 = vpop.f32.mrb[11].mxu1 }
  0xfc   : > { %520 = vst [vmem:[%s888_s28 + $0x50] sm:$0xff] %v401_v61  ;;  %536 = vst [vmem:[%s888_s28 + $0xd0] sm:$0xff] %v481_v62 }
  0xfe   : > { %v709_v63 = vpop.f32.mrb[12].mxu0  ;;  %v733_v0 = vpop.f32.mrb[12].mxu1 }
  0xff   : > { %523 = vst [vmem:[%s888_s28 + $0x68] sm:$0xff] %v709_v63  ;;  %539 = vst [vmem:[%s888_s28 + $0xe8] sm:$0xff] %v733_v0  ;;  %v411_v1 = vpop.f32.mrb[13].mxu0  ;;  %v491_v2 = vpop.f32.mrb[13].mxu1 }
 0x100   : > { %522 = vst [vmem:[%s888_s28 + $0x60] sm:$0xff] %v411_v1  ;;  %538 = vst [vmem:[%s888_s28 + $0xe0] sm:$0xff] %v491_v2 }
 0x102   : > { %v712_v3 = vpop.f32.mrb[14].mxu0  ;;  %v736_v4 = vpop.f32.mrb[14].mxu1 }
 0x103   : > { %525 = vst [vmem:[%s888_s28 + $0x78] sm:$0xff] %v712_v3  ;;  %541 = vst [vmem:[%s888_s28 + $0xf8] sm:$0xff] %v736_v4  ;;  %v421_v5 = vpop.f32.mrb[15].mxu0  ;;  %v501_v6 = vpop.f32.mrb[15].mxu1 }
 0x104   : > { %524 = vst [vmem:[%s888_s28 + $0x70] sm:$0xff] %v421_v5  ;;  %540 = vst [vmem:[%s888_s28 + $0xf0] sm:$0xff] %v501_v6 }
 0x105 PF: > { %s12_s9 = sadd.s32 1, %s765_s9  }
 0x106   : > { %p9_p4 = scmp.ge.s32.totalorder %s12_s9, 4  }
 0x108   :  { %11 = sbr.rel (!%p9_p4) target bundleno = 1 (0x1), region = 58 }

// kernel: octave_forward.18
= control target key start
LH: loop header
LB: loop body
LE: loop exit
PB: predicated region body
PF: predicated region fallthrough
CT: control target
= control target key end

     0   :  { %s768_s9 = smov 0   ;;  %s901_s0 = inlined_call_operand.vmem [shape: f32[512,18], index: 0, kind: input, shape index: {}]   ;;  %s902_s1 = inlined_call_operand.vmem [shape: f32[18,128], index: 1, kind: input, shape index: {}]   ;;  %s903_s2 = inlined_call_operand.vmem [shape: f32[512,128], index: 2, kind: output, shape index: {}]  }
   0x1 LB: > { %s596_s10 = sadd.s32 4294967295, %s751_s9   ;;  %p600_p0 = scmp.ge.s32.totalorder %s751_s9, 1  ;;  %s751_s9 = sphi %s768_s9, %s12_s9  }
   0x2   : > { %p113_p1 = scmp.lt.s32.totalorder %s751_s9, 3 }
   0x4   : > { %p114_p2 = pnand %p600_p0, %p113_p1 }
   0x5   : > { %v179_v0 = vld [vmem:[%s902_s1] sm:$0xff] (!%p114_p2)  ;;  %v180_v1 = vld [vmem:[%s902_s1 + $0x8] sm:$0xff] (!%p114_p2)  ;;  %s601_s15 = sshll.u32 (!%p114_p2), %s596_s10, 5  ;;  %v181_v3 = vld [vmem:[%s902_s1 + $0x10] sm:$0x3] (!%p114_p2)  ;;  %vm279_vm0 = vcmask (!%p114_p2), 1041408  }
   0x6   : > { %117 = sbr.rel (%p114_p2) target bundleno = 261 (0x105), region = 28  ;;  %v729_v2 = vpack.c.bf16 (!%p114_p2), %v180_v1, %v179_v0  ;;  %p136_p3 = scmp.lt.s32.totalorder (!%p114_p2), %s601_s15, 63  ;;  %vm182_vm1 = vcmask (!%p114_p2), 146432  }
   0x8   : > { %730 = vmatprep.subr.bf16.mxu0 (!%p114_p2), %v729_v2  ;;  %733 = vmatprep.subr.bf16.mxu1 (!%p114_p2), %v729_v2 }
   0x9   : > { %732 = vmatpush3.bf16.msra.mxu0 (!%p114_p2), %v729_v2  ;;  %735 = vmatpush3.bf16.msra.mxu1 (!%p114_p2), %v729_v2 }
   0xa   : > { %679 = vmatprep.subr.msk.mxu0 (!%p114_p2), %vm279_vm0, %v181_v3  ;;  %734 = vmatprep.subr.msk.mxu1 (!%p114_p2), %vm279_vm0, %v181_v3 }
   0xd   : > { %s905_s15 = smov (!%p136_p3, %s601_s15), 63  ;;  %680 = vmatpush3.msk.msra.mxu0 %vm279_vm0, %v181_v3  ;;  %736 = vmatpush3.msk.msra.mxu1 %vm279_vm0, %v181_v3 }
   0xe   : > { %s602_s18 = sshll.u32 %s905_s15, 3 }
   0xf   : > { %s793_s21 = scalar_lea.vmem %s901_s0, %s602_s18  ;;  %s864_s24 = scalar_lea.vmem %s903_s2, %s602_s18 }
  0x10   : > { %v147_v4 = vld [vmem:[%s793_s21] sm:$0xff]  ;;  %v148_v6 = vld [vmem:[%s793_s21 + $0x8] sm:$0xff]  ;;  %v149_v8 = vld [vmem:[%s793_s21 + $0x10] sm:$0xff] }
  0x11   : > { %v163_v5 = vld [vmem:[%s793_s21 + $0x80] sm:$0xff]  ;;  %v164_v7 = vld [vmem:[%s793_s21 + $0x88] sm:$0xff]  ;;  %v165_v9 = vld [vmem:[%s793_s21 + $0x90] sm:$0xff]  ;;  %681 = vmatprep.mubr.msk.f32.mxu0 %vm182_vm1, %v147_v4 }
  0x12   : > { %705 = vmatprep.mubr.msk.f32.mxu1 %vm182_vm1, %v163_v5  ;;  %682 = vmatmul.mubr.msk.f32.vlgmr.msra.gmra.mrb[0].mxu0 %vm182_vm1, %v148_v6  ;;  %v150_v10 = vld [vmem:[%s793_s21 + $0x18] sm:$0xff]  ;;  %v151_v12 = vld [vmem:[%s793_s21 + $0x20] sm:$0xff]  ;;  %v152_v14 = vld [vmem:[%s793_s21 + $0x28] sm:$0xff] }
  0x13   : > { %706 = vmatmul.mubr.msk.f32.vlgmr.msra.gmra.mrb[0].mxu1 %vm182_vm1, %v164_v7  ;;  %684 = vmatprep.mubr.msk.f32.mxu0 %vm182_vm1, %v149_v8  ;;  %v166_v11 = vld [vmem:[%s793_s21 + $0x98] sm:$0xff]  ;;  %v167_v13 = vld [vmem:[%s793_s21 + $0xa0] sm:$0xff]  ;;  %v168_v15 = vld [vmem:[%s793_s21 + $0xa8] sm:$0xff] }
  0x14   : > { %708 = vmatprep.mubr.msk.f32.mxu1 %vm182_vm1, %v165_v9  ;;  %v153_v16 = vld [vmem:[%s793_s21 + $0x30] sm:$0xff]  ;;  %v154_v18 = vld [vmem:[%s793_s21 + $0x38] sm:$0xff]  ;;  %v155_v20 = vld [vmem:[%s793_s21 + $0x40] sm:$0xff] }
  0x15   : > { %v169_v17 = vld [vmem:[%s793_s21 + $0xb0] sm:$0xff]  ;;  %v170_v19 = vld [vmem:[%s793_s21 + $0xb8] sm:$0xff]  ;;  %v171_v21 = vld [vmem:[%s793_s21 + $0xc0] sm:$0xff] }
  0x16   : > { %685 = vmatmul.mubr.msk.f32.gmra.mrb[2].mxu0 %vm182_vm1, %v150_v10  ;;  %v156_v22 = vld [vmem:[%s793_s21 + $0x48] sm:$0xff]  ;;  %v157_v24 = vld [vmem:[%s793_s21 + $0x50] sm:$0xff]  ;;  %v158_v26 = vld [vmem:[%s793_s21 + $0x58] sm:$0xff] }
  0x17   : > { %709 = vmatmul.mubr.msk.f32.gmra.mrb[2].mxu1 %vm182_vm1, %v166_v11  ;;  %687 = vmatprep.mubr.msk.f32.mxu0 %vm182_vm1, %v151_v12  ;;  %v172_v23 = vld [vmem:[%s793_s21 + $0xc8] sm:$0xff]  ;;  %v173_v25 = vld [vmem:[%s793_s21 + $0xd0] sm:$0xff]  ;;  %v174_v27 = vld [vmem:[%s793_s21 + $0xd8] sm:$0xff] }
  0x18   : > { %711 = vmatprep.mubr.msk.f32.mxu1 %vm182_vm1, %v167_v13  ;;  %v159_v28 = vld [vmem:[%s793_s21 + $0x60] sm:$0xff]  ;;  %v160_v30 = vld [vmem:[%s793_s21 + $0x68] sm:$0xff]  ;;  %v161_v32 = vld [vmem:[%s793_s21 + $0x70] sm:$0xff] }
  0x19   : > { %v175_v29 = vld [vmem:[%s793_s21 + $0xe0] sm:$0xff]  ;;  %v176_v31 = vld [vmem:[%s793_s21 + $0xe8] sm:$0xff]  ;;  %v177_v33 = vld [vmem:[%s793_s21 + $0xf0] sm:$0xff] }
  0x1a   : > { %688 = vmatmul.mubr.msk.f32.gmra.mrb[4].mxu0 %vm182_vm1, %v152_v14  ;;  %v162_v34 = vld [vmem:[%s793_s21 + $0x78] sm:$0xff] }
  0x1b   : > { %712 = vmatmul.mubr.msk.f32.gmra.mrb[4].mxu1 %vm182_vm1, %v168_v15  ;;  %690 = vmatprep.mubr.msk.f32.mxu0 %vm182_vm1, %v153_v16  ;;  %v178_v35 = vld [vmem:[%s793_s21 + $0xf8] sm:$0xff] }
  0x1c   : > { %714 = vmatprep.mubr.msk.f32.mxu1 %vm182_vm1, %v169_v17 }
  0x1e   : > { %691 = vmatmul.mubr.msk.f32.gmra.mrb[6].mxu0 %vm182_vm1, %v154_v18 }
  0x1f   : > { %715 = vmatmul.mubr.msk.f32.gmra.mrb[6].mxu1 %vm182_vm1, %v170_v19  ;;  %693 = vmatprep.mubr.msk.f32.mxu0 %vm182_vm1, %v155_v20 }
  0x20   : > { %717 = vmatprep.mubr.msk.f32.mxu1 %vm182_vm1, %v171_v21 }
  0x22   : > { %694 = vmatmul.mubr.msk.f32.gmra.mrb[8].mxu0 %vm182_vm1, %v156_v22 }
  0x23   : > { %718 = vmatmul.mubr.msk.f32.gmra.mrb[8].mxu1 %vm182_vm1, %v172_v23  ;;  %696 = vmatprep.mubr.msk.f32.mxu0 %vm182_vm1, %v157_v24 }
  0x24   : > { %720 = vmatprep.mubr.msk.f32.mxu1 %vm182_vm1, %v173_v25 }
  0x26   : > { %697 = vmatmul.mubr.msk.f32.gmra.mrb[10].mxu0 %vm182_vm1, %v158_v26 }
  0x27   : > { %721 = vmatmul.mubr.msk.f32.gmra.mrb[10].mxu1 %vm182_vm1, %v174_v27  ;;  %699 = vmatprep.mubr.msk.f32.mxu0 %vm182_vm1, %v159_v28 }
  0x28   : > { %723 = vmatprep.mubr.msk.f32.mxu1 %vm182_vm1, %v175_v29 }
  0x2a   : > { %700 = vmatmul.mubr.msk.f32.gmra.mrb[12].mxu0 %vm182_vm1, %v160_v30 }
  0x2b   : > { %724 = vmatmul.mubr.msk.f32.gmra.mrb[12].mxu1 %vm182_vm1, %v176_v31  ;;  %702 = vmatprep.mubr.msk.f32.mxu0 %vm182_vm1, %v161_v32 }
  0x2c   : > { %726 = vmatprep.mubr.msk.f32.mxu1 %vm182_vm1, %v177_v33 }
  0x2e   : > { %703 = vmatmul.mubr.msk.f32.gmra.mrb[14].mxu0 %vm182_vm1, %v162_v34 }
  0x2f   : > { %727 = vmatmul.mubr.msk.f32.gmra.mrb[14].mxu1 %vm182_vm1, %v178_v35 }
  0xe5   : > { %v683_v36 = vpop.f32.mrb[0].mxu0 }
  0xe6   : > { %v707_v37 = vpop.f32.mrb[0].mxu1  ;;  %509 = vst [vmem:[%s864_s24 + $0x8] sm:$0xff] %v683_v36  ;;  %v349_v38 = vpop.f32.mrb[1].mxu0 }
  0xe7   : > { %525 = vst [vmem:[%s864_s24 + $0x88] sm:$0xff] %v707_v37  ;;  %v429_v39 = vpop.f32.mrb[1].mxu1  ;;  %508 = vst [vmem:[%s864_s24] sm:$0xff] %v349_v38 }
  0xe8   : > { %524 = vst [vmem:[%s864_s24 + $0x80] sm:$0xff] %v429_v39 }
  0xe9   : > { %v686_v40 = vpop.f32.mrb[2].mxu0 }
  0xea   : > { %v710_v41 = vpop.f32.mrb[2].mxu1  ;;  %511 = vst [vmem:[%s864_s24 + $0x18] sm:$0xff] %v686_v40  ;;  %v359_v42 = vpop.f32.mrb[3].mxu0 }
  0xeb   : > { %527 = vst [vmem:[%s864_s24 + $0x98] sm:$0xff] %v710_v41  ;;  %v439_v43 = vpop.f32.mrb[3].mxu1  ;;  %510 = vst [vmem:[%s864_s24 + $0x10] sm:$0xff] %v359_v42 }
  0xec   : > { %526 = vst [vmem:[%s864_s24 + $0x90] sm:$0xff] %v439_v43 }
  0xed   : > { %v689_v44 = vpop.f32.mrb[4].mxu0 }
  0xee   : > { %v713_v45 = vpop.f32.mrb[4].mxu1  ;;  %513 = vst [vmem:[%s864_s24 + $0x28] sm:$0xff] %v689_v44  ;;  %v369_v46 = vpop.f32.mrb[5].mxu0 }
  0xef   : > { %529 = vst [vmem:[%s864_s24 + $0xa8] sm:$0xff] %v713_v45  ;;  %v449_v47 = vpop.f32.mrb[5].mxu1  ;;  %512 = vst [vmem:[%s864_s24 + $0x20] sm:$0xff] %v369_v46 }
  0xf0   : > { %528 = vst [vmem:[%s864_s24 + $0xa0] sm:$0xff] %v449_v47 }
  0xf1   : > { %v692_v48 = vpop.f32.mrb[6].mxu0 }
  0xf2   : > { %v716_v49 = vpop.f32.mrb[6].mxu1  ;;  %515 = vst [vmem:[%s864_s24 + $0x38] sm:$0xff] %v692_v48  ;;  %v379_v50 = vpop.f32.mrb[7].mxu0 }
  0xf3   : > { %531 = vst [vmem:[%s864_s24 + $0xb8] sm:$0xff] %v716_v49  ;;  %v459_v51 = vpop.f32.mrb[7].mxu1  ;;  %514 = vst [vmem:[%s864_s24 + $0x30] sm:$0xff] %v379_v50 }
  0xf4   : > { %530 = vst [vmem:[%s864_s24 + $0xb0] sm:$0xff] %v459_v51 }
  0xf5   : > { %v695_v52 = vpop.f32.mrb[8].mxu0 }
  0xf6   : > { %v719_v53 = vpop.f32.mrb[8].mxu1  ;;  %517 = vst [vmem:[%s864_s24 + $0x48] sm:$0xff] %v695_v52  ;;  %v389_v54 = vpop.f32.mrb[9].mxu0 }
  0xf7   : > { %533 = vst [vmem:[%s864_s24 + $0xc8] sm:$0xff] %v719_v53  ;;  %v469_v55 = vpop.f32.mrb[9].mxu1  ;;  %516 = vst [vmem:[%s864_s24 + $0x40] sm:$0xff] %v389_v54 }
  0xf8   : > { %532 = vst [vmem:[%s864_s24 + $0xc0] sm:$0xff] %v469_v55 }
  0xf9   : > { %v698_v56 = vpop.f32.mrb[10].mxu0 }
  0xfa   : > { %v722_v57 = vpop.f32.mrb[10].mxu1  ;;  %519 = vst [vmem:[%s864_s24 + $0x58] sm:$0xff] %v698_v56  ;;  %v399_v58 = vpop.f32.mrb[11].mxu0 }
  0xfb   : > { %535 = vst [vmem:[%s864_s24 + $0xd8] sm:$0xff] %v722_v57  ;;  %v479_v59 = vpop.f32.mrb[11].mxu1  ;;  %518 = vst [vmem:[%s864_s24 + $0x50] sm:$0xff] %v399_v58 }
  0xfc   : > { %534 = vst [vmem:[%s864_s24 + $0xd0] sm:$0xff] %v479_v59 }
  0xfd   : > { %v701_v60 = vpop.f32.mrb[12].mxu0 }
  0xfe   : > { %v725_v61 = vpop.f32.mrb[12].mxu1  ;;  %521 = vst [vmem:[%s864_s24 + $0x68] sm:$0xff] %v701_v60  ;;  %v409_v62 = vpop.f32.mrb[13].mxu0 }
  0xff   : > { %537 = vst [vmem:[%s864_s24 + $0xe8] sm:$0xff] %v725_v61  ;;  %v489_v63 = vpop.f32.mrb[13].mxu1  ;;  %520 = vst [vmem:[%s864_s24 + $0x60] sm:$0xff] %v409_v62 }
 0x100   : > { %536 = vst [vmem:[%s864_s24 + $0xe0] sm:$0xff] %v489_v63 }
 0x101   : > { %v704_v0 = vpop.f32.mrb[14].mxu0 }
 0x102   : > { %v728_v1 = vpop.f32.mrb[14].mxu1  ;;  %523 = vst [vmem:[%s864_s24 + $0x78] sm:$0xff] %v704_v0  ;;  %v419_v2 = vpop.f32.mrb[15].mxu0 }
 0x103   : > { %539 = vst [vmem:[%s864_s24 + $0xf8] sm:$0xff] %v728_v1  ;;  %v499_v3 = vpop.f32.mrb[15].mxu1  ;;  %522 = vst [vmem:[%s864_s24 + $0x70] sm:$0xff] %v419_v2 }
 0x104   : > { %538 = vst [vmem:[%s864_s24 + $0xf0] sm:$0xff] %v499_v3 }
 0x105 PF: > { %s12_s9 = sadd.s32 1, %s751_s9  }
 0x106   : > { %p9_p4 = scmp.ge.s32.totalorder %s12_s9, 4  }
 0x108   :  { %11 = sbr.rel (!%p9_p4) target bundleno = 1 (0x1), region = 58 }

</bundles_post_ra>
